<compile_context>
chip_gen: v5e
topology: v5e:2x2
jax: 0.10.0
libtpu: 0.0.40
codegen_flags: <defaults>
</compile_context>

<pallas_src>
import jax
import jax.numpy as jnp
from jax.experimental import pallas as pl
from jax.experimental.pallas import tpu as pltpu

HIDDEN = 128      # fc1 output width
NUM_CLASSES = 2   # fc2 output width


def simple_nn_kernel(x_ref, w1_ref, b1_ref, w2_ref, b2_ref, o_ref):
    # fc1: bf16 operands on the MXU (cast in-kernel, hidden under DMA), f32 accumulate.
    x = x_ref[...].astype(jnp.bfloat16)
    w1 = w1_ref[...].astype(jnp.bfloat16)
    h = jnp.dot(x, w1, preferred_element_type=jnp.float32)
    # Bias + ReLU in f32 on the VPU (v5e has no bf16 VALU path).
    h = jnp.maximum(h + b1_ref[...], 0.0)
    # fc2: narrow (tb, 2) result; N=2 is padded internally by the MXU, store is masked.
    w2 = w2_ref[...].astype(jnp.bfloat16)
    out = jnp.dot(h.astype(jnp.bfloat16), w2, preferred_element_type=jnp.float32)
    o_ref[...] = (out + b2_ref[...]).astype(o_ref.dtype)


def _round_up(n, m):
    return ((n + m - 1) // m) * m


def simple_nn_forward(x, w1, b1, w2, b2, *, block_b=4096):
    """x: (B, K) f32, w1: (K, 128) f32, b1: (1, 128) f32,
       w2: (128, 2) f32, b2: (1, 2) f32.  Returns (B, 2) f32 logits."""
    B, K = x.shape
    H = w1.shape[1]
    N = w2.shape[1]

    # Batch tile: multiple of 8 (f32 sublane), capped at block_b.
    tb = min(block_b, _round_up(B, 8))
    # v7x megacore: if the whole batch would fit one tile but is big enough,
    # split it into >=2 parallel tiles so both TensorCores get work.
    if _round_up(B, 8) <= block_b and B >= 16:
        tb = min(tb, _round_up((B + 1) // 2, 8))

    grid = (pl.cdiv(B, tb),)   # partial last block handled by Pallas masking

    cost = pl.CostEstimate(
        flops=2 * B * (K * H + H * N),
        transcendentals=0,
        bytes_accessed=(x.size * 4 + w1.size * 4 + b1.size * 4
                        + w2.size * 4 + b2.size * 4 + B * N * 4),
    )

    return pl.pallas_call(
        simple_nn_kernel,
        out_shape=jax.ShapeDtypeStruct((B, N), jnp.float32),
        grid=grid,
        in_specs=[
            pl.BlockSpec((tb, K), lambda i: (i, 0)),   # activations, tiled over batch
            pl.BlockSpec((K, H), lambda i: (0, 0)),    # w1, resident
            pl.BlockSpec((1, H), lambda i: (0, 0)),    # b1, resident
            pl.BlockSpec((H, N), lambda i: (0, 0)),    # w2, resident
            pl.BlockSpec((1, N), lambda i: (0, 0)),    # b2, resident
        ],
        out_specs=pl.BlockSpec((tb, N), lambda i: (i, 0)),
        compiler_params=pltpu.CompilerParams(
            dimension_semantics=("parallel",),  # batch tiles shard across TCs on v7x
        ),
        cost_estimate=cost,
    )(x, w1, b1, w2, b2)


def init_params(key, input_size, hidden=HIDDEN, num_classes=NUM_CLASSES):
    """Deterministic init mimicking torch.nn.Linear default U(-1/sqrt(fan_in), 1/sqrt(fan_in))."""
    k1, k2, k3, k4 = jax.random.split(key, 4)
    bound1 = 1.0 / (input_size ** 0.5)
    bound2 = 1.0 / (hidden ** 0.5)
    w1 = jax.random.uniform(k1, (input_size, hidden), jnp.float32, -bound1, bound1)
    b1 = jax.random.uniform(k2, (1, hidden), jnp.float32, -bound1, bound1)
    w2 = jax.random.uniform(k3, (hidden, num_classes), jnp.float32, -bound2, bound2)
    b2 = jax.random.uniform(k4, (1, num_classes), jnp.float32, -bound2, bound2)
    return w1, b1, w2, b2


def _reference(x, w1, b1, w2, b2):
    """Reference in matching precision: bf16-rounded operands, f32 accumulate."""
    hp = jax.lax.Precision.HIGHEST
    xb = x.astype(jnp.bfloat16).astype(jnp.float32)
    w1b = w1.astype(jnp.bfloat16).astype(jnp.float32)
    w2b = w2.astype(jnp.bfloat16).astype(jnp.float32)
    h = jnp.maximum(jnp.dot(xb, w1b, precision=hp) + b1, 0.0)
    hb = h.astype(jnp.bfloat16).astype(jnp.float32)
    return jnp.dot(hb, w2b, precision=hp) + b2


if __name__ == "__main__":
    key = jax.random.PRNGKey(0)
    kx, kp = jax.random.split(key)

    batch = 8
    input_size = 32  # churn-feature vector size (arbitrary, small)

    x = jax.random.normal(kx, (batch, input_size), jnp.float32)
    w1, b1, w2, b2 = init_params(kp, input_size)

    # Small-batch path (single tile).
    out = simple_nn_forward(x, w1, b1, w2, b2)
    out = jax.block_until_ready(out)
    assert out.shape == (batch, NUM_CLASSES)
    ref = _reference(x, w1, b1, w2, b2)
    assert jnp.allclose(out, ref, atol=1e-2, rtol=1e-2), "mismatch vs reference (small batch)"

    # Exercise the batch-tiled grid path: >=2 parallel tiles, batch not a multiple
    # of 8 or of the tile, so Pallas masks the ragged last block.
    big_batch = 1043
    xb = jax.random.normal(kx, (big_batch, input_size), jnp.float32)
    outb = jax.block_until_ready(simple_nn_forward(xb, w1, b1, w2, b2))
    assert outb.shape == (big_batch, NUM_CLASSES)
    refb = _reference(xb, w1, b1, w2, b2)
    assert jnp.allclose(outb, refb, atol=1e-2, rtol=1e-2), "mismatch vs reference (tiled batch)"

    print("KERNEL_OK")
</pallas_src>

<mosaic_0001>
module attributes {stable_mosaic.version = 11 : i64} {
  func.func @simple_nn_kernel(%arg0: i32, %arg1: memref<8x32xf32, #tpu.memory_space<vmem>>, %arg2: memref<32x128xf32, #tpu.memory_space<vmem>>, %arg3: memref<1x128xf32, #tpu.memory_space<vmem>>, %arg4: memref<128x2xf32, #tpu.memory_space<vmem>>, %arg5: memref<1x2xf32, #tpu.memory_space<vmem>>, %arg6: memref<8x2xf32, #tpu.memory_space<vmem>>) attributes {dimension_semantics = [#tpu.dimension_semantics<parallel>], iteration_bounds = array<i64: 1>, scalar_prefetch = 0 : i64, scratch_operands = 0 : i64, tpu.core_type = #tpu.core_type<tc>, window_params = [{transform_indices = @transform_0, window_bounds = array<i64: 8, 32>}, {pipeline_mode = #tpu.pipeline_mode<synchronous>, transform_indices = @transform_1, window_bounds = array<i64: 32, 128>}, {pipeline_mode = #tpu.pipeline_mode<synchronous>, transform_indices = @transform_2, window_bounds = array<i64: 1, 128>}, {pipeline_mode = #tpu.pipeline_mode<synchronous>, transform_indices = @transform_3, window_bounds = array<i64: 128, 2>}, {pipeline_mode = #tpu.pipeline_mode<synchronous>, transform_indices = @transform_4, window_bounds = array<i64: 1, 2>}, {transform_indices = @transform_5, window_bounds = array<i64: 8, 2>}]} {
    %c0 = arith.constant 0 : index
    %c0_0 = arith.constant 0 : index
    %0 = vector.load %arg1[%c0, %c0_0] : memref<8x32xf32, #tpu.memory_space<vmem>>, vector<8x32xf32>
    %1 = arith.truncf %0 : vector<8x32xf32> to vector<8x32xbf16>
    %c0_1 = arith.constant 0 : index
    %c0_2 = arith.constant 0 : index
    %2 = vector.load %arg2[%c0_1, %c0_2] : memref<32x128xf32, #tpu.memory_space<vmem>>, vector<32x128xf32>
    %3 = arith.truncf %2 : vector<32x128xf32> to vector<32x128xbf16>
    %cst = arith.constant dense<0.000000e+00> : vector<8x128xf32>
    %4 = tpu.matmul %1, %3, %cst {dimension_numbers = #tpu.dot_dimension_numbers<[1], [0], [0], [1], [0, 0, 1, 1], [], []>} : vector<8x32xbf16>, vector<32x128xbf16>, vector<8x128xf32> -> vector<8x128xf32>
    %c0_3 = arith.constant 0 : index
    %c0_4 = arith.constant 0 : index
    %5 = vector.load %arg3[%c0_3, %c0_4] : memref<1x128xf32, #tpu.memory_space<vmem>>, vector<1x128xf32>
    %6 = vector.broadcast %5 : vector<1x128xf32> to vector<8x128xf32>
    %7 = arith.addf %4, %6 : vector<8x128xf32>
    %cst_5 = arith.constant 0.000000e+00 : f32
    %8 = vector.broadcast %cst_5 : f32 to vector<8x128xf32>
    %9 = arith.maximumf %7, %8 : vector<8x128xf32>
    %c0_6 = arith.constant 0 : index
    %c0_7 = arith.constant 0 : index
    %10 = vector.load %arg4[%c0_6, %c0_7] : memref<128x2xf32, #tpu.memory_space<vmem>>, vector<128x2xf32>
    %11 = arith.truncf %10 : vector<128x2xf32> to vector<128x2xbf16>
    %12 = arith.truncf %9 : vector<8x128xf32> to vector<8x128xbf16>
    %cst_8 = arith.constant dense<0.000000e+00> : vector<8x2xf32>
    %13 = tpu.matmul %12, %11, %cst_8 {dimension_numbers = #tpu.dot_dimension_numbers<[1], [0], [0], [1], [0, 0, 1, 1], [], []>} : vector<8x128xbf16>, vector<128x2xbf16>, vector<8x2xf32> -> vector<8x2xf32>
    %c0_9 = arith.constant 0 : index
    %c0_10 = arith.constant 0 : index
    %14 = vector.load %arg5[%c0_9, %c0_10] : memref<1x2xf32, #tpu.memory_space<vmem>>, vector<1x2xf32>
    %15 = vector.broadcast %14 : vector<1x2xf32> to vector<8x2xf32>
    %16 = arith.addf %13, %15 : vector<8x2xf32>
    %c0_11 = arith.constant 0 : index
    %c0_12 = arith.constant 0 : index
    %17 = vector.load %arg6[%c0_11, %c0_12] : memref<8x2xf32, #tpu.memory_space<vmem>>, vector<8x2xf32>
    tpu.vector_store %arg6[%c0_11, %c0_12], %16 {strides = array<i32>} : memref<8x2xf32, #tpu.memory_space<vmem>>, vector<8x2xf32>,
    return
  }
  func.func @transform_0(%arg0: i32) -> (i32, i32) {
    %c0_i32 = arith.constant 0 : i32
    %c0_i32_0 = arith.constant 0 : i32
    return %arg0, %c0_i32 : i32, i32
  }
  func.func @transform_1(%arg0: i32) -> (i32, i32) {
    %c0_i32 = arith.constant 0 : i32
    %c0_i32_0 = arith.constant 0 : i32
    %c0_i32_1 = arith.constant 0 : i32
    return %c0_i32, %c0_i32_0 : i32, i32
  }
  func.func @transform_2(%arg0: i32) -> (i32, i32) {
    %c0_i32 = arith.constant 0 : i32
    %c0_i32_0 = arith.constant 0 : i32
    %c0_i32_1 = arith.constant 0 : i32
    return %c0_i32, %c0_i32_0 : i32, i32
  }
  func.func @transform_3(%arg0: i32) -> (i32, i32) {
    %c0_i32 = arith.constant 0 : i32
    %c0_i32_0 = arith.constant 0 : i32
    %c0_i32_1 = arith.constant 0 : i32
    return %c0_i32, %c0_i32_0 : i32, i32
  }
  func.func @transform_4(%arg0: i32) -> (i32, i32) {
    %c0_i32 = arith.constant 0 : i32
    %c0_i32_0 = arith.constant 0 : i32
    %c0_i32_1 = arith.constant 0 : i32
    return %c0_i32, %c0_i32_0 : i32, i32
  }
  func.func @transform_5(%arg0: i32) -> (i32, i32) {
    %c0_i32 = arith.constant 0 : i32
    %c0_i32_0 = arith.constant 0 : i32
    return %arg0, %c0_i32 : i32, i32
  }
}

</mosaic_0001>

<bundles_post_ra>
// kernel: tpu_custom_call.1
= control target key start
LH: loop header
LB: loop body
LE: loop exit
PB: predicated region body
PF: predicated region fallthrough
CT: control target
= control target key end

     0   :  { %vm33_vm0 = vcmask 261120   ;;  %vm93_vm1 = vcmask 15360   ;;  %s204_s1 = inlined_call_operand.vmem [shape: f32[32,128], index: 1, kind: input, shape index: {}]   ;;  %s205_s3 = inlined_call_operand.vmem [shape: f32[128,2], index: 3, kind: input, shape index: {}]   ;;  %s206_s0 = inlined_call_operand.vmem [shape: f32[8,32], index: 0, kind: input, shape index: {}]   ;;  %s207_s2 = inlined_call_operand.vmem [shape: f32[1,128], index: 2, kind: input, shape index: {}]   ;;  %s208_s4 = inlined_call_operand.vmem [shape: f32[1,2], index: 4, kind: input, shape index: {}]   ;;  %s209_s5 = inlined_call_operand.vmem [shape: f32[8,2], index: 5, kind: output, shape index: {}]  }
   0x1   :  { %v25_v0 = vld [vmem:[%s204_s1 + $0x10] sm:$0xff]  ;;  %v26_v1 = vld [vmem:[%s204_s1 + $0x18] sm:$0xff]  ;;  %v23_v2 = vld [vmem:[%s204_s1] sm:$0xff] }
   0x2   :  { %v28_v3 = vpack.c.bf16 %v26_v1, %v25_v0  ;;  %v24_v4 = vld [vmem:[%s204_s1 + $0x8] sm:$0xff]  ;;  %v65_v5 = vld [vmem:[%s205_s3 + $0x70] sm:$0xff]  ;;  %v66_v6 = vld [vmem:[%s205_s3 + $0x78] sm:$0xff] }
   0x3   :  { %v63_v7 = vld [vmem:[%s205_s3 + $0x60] sm:$0xff]  ;;  %v64_v8 = vld [vmem:[%s205_s3 + $0x68] sm:$0xff]  ;;  %v27_v9 = vpack.c.bf16 %v24_v4, %v23_v2  ;;  %v74_v11 = vpack.c.bf16 %v66_v6, %v65_v5  ;;  %v61_v14 = vld [vmem:[%s205_s3 + $0x50] sm:$0xff] }
   0x4   :  { %43 = vmatpush.bf16.msra.mxu0 %v28_v3  ;;  %v21_v10 = vld [vmem:[%s206_s0] sm:$0xff]  ;;  %v73_v12 = vpack.c.bf16 %v64_v8, %v63_v7  ;;  %v62_v15 = vld [vmem:[%s205_s3 + $0x58] sm:$0xff]  ;;  %v60_v18 = vld [vmem:[%s205_s3 + $0x48] sm:$0xff] }
   0x5   :  { %80 = vmatpush.bf16.msra.mxu1 %v74_v11  ;;  %v22_v13 = vpack.c.bf16 %v21_v10, %v21_v10  ;;  %v72_v16 = vpack.c.bf16 %v62_v15, %v61_v14  ;;  %v59_v17 = vld [vmem:[%s205_s3 + $0x40] sm:$0xff]  ;;  %v57_v20 = vld [vmem:[%s205_s3 + $0x30] sm:$0xff]  ;;  %v58_v21 = vld [vmem:[%s205_s3 + $0x38] sm:$0xff] }
   0x6   :  { %v71_v19 = vpack.c.bf16 %v60_v18, %v59_v17  ;;  %v70_v22 = vpack.c.bf16 %v58_v21, %v57_v20  ;;  %v55_v23 = vld [vmem:[%s205_s3 + $0x20] sm:$0xff]  ;;  %v56_v24 = vld [vmem:[%s205_s3 + $0x28] sm:$0xff]  ;;  %v53_v26 = vld [vmem:[%s205_s3 + $0x10] sm:$0xff] }
   0x7   :  { %v69_v25 = vpack.c.bf16 %v56_v24, %v55_v23  ;;  %v54_v27 = vld [vmem:[%s205_s3 + $0x18] sm:$0xff]  ;;  %v51_v29 = vld [vmem:[%s205_s3] sm:$0xff]  ;;  %v52_v30 = vld [vmem:[%s205_s3 + $0x8] sm:$0xff] }
   0x8   :  { %44 = vmatpush.bf16.msra.mxu0 %v27_v9  ;;  %v68_v28 = vpack.c.bf16 %v54_v27, %v53_v26  ;;  %v67_v31 = vpack.c.bf16 %v52_v30, %v51_v29  ;;  %v100_v32 = vld [vmem:[%s207_s2] ss:$0 sm:$0xff] }
   0x9   :  { %81 = vmatpush.bf16.msra.mxu1 %v73_v12  ;;  %v101_v38 = vld [vmem:[%s208_s4] ss:$0 sm:$0xff] }
   0xb   :  { %99 = vmatmul.msk.bf16.vlgmr.msra.gmra.mxu0 %vm33_vm0, %v22_v13 }
   0xd   :  { %82 = vmatpush.bf16.msra.mxu1 %v72_v16 }
  0x11   :  { %83 = vmatpush.bf16.msra.mxu1 %v71_v19 }
  0x15   :  { %84 = vmatpush.bf16.msra.mxu1 %v70_v22 }
  0x19   :  { %85 = vmatpush.bf16.msra.mxu1 %v69_v25 }
  0x1d   :  { %86 = vmatpush.bf16.msra.mxu1 %v68_v28 }
  0x21   :  { %87 = vmatpush.bf16.msra.mxu1 %v67_v31 }
  0x88   :  { %v46_v33 = vpop.f32.mrf.mxu0 }
  0x89   :  { %v47_v34 = vadd.f32 %v100_v32, %v46_v33 }
  0x8b   :  { %v50_v35 = vmax.f32 %v47_v34, 0.0 }
  0x8d   :  { %v75_v36 = vpack.c.bf16 %v50_v35, %v50_v35 }
  0x8f   :  { %88 = vmatmul.bf16.vlgmr.msra.gmra.mxu1 %v75_v36 }
  0x90   :  { %v48_v37 = vpop.f32.mrf.mxu0 }
 0x10c   :  { %v89_v39 = vpop.f32.mrf.mxu1 }
 0x10d   :  { %v90_v40 = vadd.f32 %v101_v38, %v89_v39 }
 0x10f   :  { %94 = vst.msk [vmem:[%s209_s5] sm:$0xff] %vm93_vm1, %v90_v40 }
 0x114   :  { %v91_v41 = vpop.f32.mrf.mxu1 }

</bundles_post_ra>
